<compile_context>
chip_gen: v7x
topology: tpu7x:2x2x1
jax: 0.10.0
libtpu: 0.0.40
codegen_flags: <defaults>
</compile_context>

<pallas_src>
import functools

import jax
import jax.numpy as jnp
from jax import lax
from jax.experimental import pallas as pl
from jax.experimental.pallas import tpu as pltpu


_MAX_TILE_B = 512  # rows per grid step: multiple of 8, big enough to amortize grid overhead


def _sum_kernel(x_ref, s_ref, *, tile_b, n_rows, inv_count):
    """Accumulate sum(x) over batch tiles; emit mean = sum * inv_count at the end."""
    i = pl.program_id(0)

    @pl.when(i == 0)
    def _():
        s_ref[...] = jnp.zeros_like(s_ref)

    tile = x_ref[...].astype(jnp.float32)
    # Mask rows past the true batch size (handles a ragged last tile safely).
    row = i * tile_b + lax.broadcasted_iota(jnp.int32, tile.shape, 0)
    tile = jnp.where(row < n_rows, tile, 0.0)
    s_ref[...] = s_ref[...] + jnp.sum(tile)

    @pl.when(i == pl.num_programs(0) - 1)
    def _():
        s_ref[...] = s_ref[...] * inv_count


def _center_kernel(mean_ref, x_ref, o_ref):
    """o = x - mean (mean is a grid-invariant SMEM scalar)."""
    o_ref[...] = (x_ref[...] - mean_ref[0, 0]).astype(o_ref.dtype)


def center(x):
    """CenterLayer forward: X - X.mean() (mean over all elements)."""
    orig_shape = x.shape
    x2 = x.reshape(orig_shape[0], -1) if x.ndim != 2 else x
    B, F = x2.shape

    tile_b = B if B <= _MAX_TILE_B else _MAX_TILE_B
    grid = (pl.cdiv(B, tile_b),)

    # Pass 1: tiled global reduction -> mean, accumulated in a resident (1,1) output.
    mean = pl.pallas_call(
        functools.partial(
            _sum_kernel, tile_b=tile_b, n_rows=B, inv_count=1.0 / float(B * F)
        ),
        grid=grid,
        in_specs=[pl.BlockSpec((tile_b, F), lambda i: (i, 0))],
        out_specs=pl.BlockSpec((1, 1), lambda i: (0, 0)),
        out_shape=jax.ShapeDtypeStruct((1, 1), jnp.float32),
        compiler_params=pltpu.CompilerParams(dimension_semantics=("arbitrary",)),
    )(x2)

    # Pass 2: tiled, pipelined subtract; batch axis parallel (uses both TCs on v7x).
    out = pl.pallas_call(
        _center_kernel,
        grid=grid,
        in_specs=[
            pl.BlockSpec(memory_space=pltpu.MemorySpace.SMEM),  # mean: resident scalar
            pl.BlockSpec((tile_b, F), lambda i: (i, 0)),
        ],
        out_specs=pl.BlockSpec((tile_b, F), lambda i: (i, 0)),
        out_shape=jax.ShapeDtypeStruct((B, F), x2.dtype),
        compiler_params=pltpu.CompilerParams(dimension_semantics=("parallel",)),
    )(mean, x2)

    return out.reshape(orig_shape)


if __name__ == "__main__":
    key = jax.random.PRNGKey(0)
    k1, k2 = jax.random.split(key)

    # Primary check: matches the module's X = torch.rand(2, 20).
    x = jax.random.uniform(k1, (2, 20), jnp.float32)
    out = jax.block_until_ready(center(x))
    ref = x - jnp.mean(x)
    assert out.shape == x.shape
    assert jnp.allclose(out, ref, atol=1e-6, rtol=1e-6)

    # Secondary check: larger batch exercising the multi-tile, pipelined grid path.
    xb = jax.random.uniform(k2, (2048, 20), jnp.float32)
    outb = jax.block_until_ready(center(xb))
    refb = xb - jnp.mean(xb)
    assert jnp.allclose(outb, refb, atol=1e-5, rtol=1e-5)

    print("KERNEL_OK")
</pallas_src>

<mosaic_0001>
module attributes {stable_mosaic.version = 11 : i64} {
  func.func @_sum_kernel(%arg0: i32, %arg1: memref<2x20xf32, #tpu.memory_space<vmem>>, %arg2: memref<1x1xf32, #tpu.memory_space<vmem>>) attributes {dimension_semantics = [#tpu.dimension_semantics<arbitrary>], iteration_bounds = array<i64: 1>, scalar_prefetch = 0 : i64, scratch_operands = 0 : i64, tpu.core_type = #tpu.core_type<tc>, window_params = [{transform_indices = @transform_0, window_bounds = array<i64: 2, 20>}, {pipeline_mode = #tpu.pipeline_mode<synchronous>, transform_indices = @transform_1, window_bounds = array<i64: 1, 1>}]} {
    %c0_i32 = arith.constant 0 : i32
    %0 = arith.cmpi eq, %arg0, %c0_i32 : i32
    %1 = arith.extui %0 : i1 to i32
    %c0_i32_0 = arith.constant 0 : i32
    %2 = arith.cmpi ne, %1, %c0_i32_0 : i32
    scf.if %2 {
      %cst_10 = arith.constant 0.000000e+00 : f32
      %23 = vector.broadcast %cst_10 : f32 to vector<1x1xf32>
      %c0_11 = arith.constant 0 : index
      %c0_12 = arith.constant 0 : index
      %24 = vector.load %arg2[%c0_11, %c0_12] : memref<1x1xf32, #tpu.memory_space<vmem>>, vector<1x1xf32>
      tpu.vector_store %arg2[%c0_11, %c0_12], %23 {strides = array<i32>} : memref<1x1xf32, #tpu.memory_space<vmem>>, vector<1x1xf32>,
    } else {
    }
    %c0 = arith.constant 0 : index
    %c0_1 = arith.constant 0 : index
    %3 = vector.load %arg1[%c0, %c0_1] : memref<2x20xf32, #tpu.memory_space<vmem>>, vector<2x20xf32>
    %c2_i32 = arith.constant 2 : i32
    %4 = arith.muli %arg0, %c2_i32 : i32
    %5 = tpu.iota {dimensions = array<i32: 0>} : vector<2x20xi32>
    %6 = vector.broadcast %4 : i32 to vector<2x20xi32>
    %7 = arith.addi %6, %5 : vector<2x20xi32>
    %c2_i32_2 = arith.constant 2 : i32
    %8 = vector.broadcast %c2_i32_2 : i32 to vector<2x20xi32>
    %9 = arith.cmpi slt, %7, %8 : vector<2x20xi32>
    %cst = arith.constant 0.000000e+00 : f32
    %10 = vector.broadcast %cst : f32 to vector<2x20xf32>
    %11 = arith.select %9, %3, %10 : vector<2x20xi1>, vector<2x20xf32>
    %c0_3 = arith.constant 0 : index
    %c0_4 = arith.constant 0 : index
    %12 = vector.load %arg2[%c0_3, %c0_4] : memref<1x1xf32, #tpu.memory_space<vmem>>, vector<1x1xf32>
    %13 = vector.shape_cast %11 : vector<2x20xf32> to vector<1x2x20xf32>
    %cst_5 = arith.constant dense<0.000000e+00> : vector<1xf32>
    %14 = vector.multi_reduction <add>, %13, %cst_5 [1, 2] : vector<1x2x20xf32> to vector<1xf32>
    %15 = vector.shape_cast %14 : vector<1xf32> to vector<1x1x1xf32>
    %16 = vector.extract %15[0, 0, 0] : f32 from vector<1x1x1xf32>
    %17 = vector.broadcast %16 : f32 to vector<1x1xf32>
    %18 = arith.addf %12, %17 : vector<1x1xf32>
    %c0_6 = arith.constant 0 : index
    %c0_7 = arith.constant 0 : index
    %19 = vector.load %arg2[%c0_6, %c0_7] : memref<1x1xf32, #tpu.memory_space<vmem>>, vector<1x1xf32>
    tpu.vector_store %arg2[%c0_6, %c0_7], %18 {strides = array<i32>} : memref<1x1xf32, #tpu.memory_space<vmem>>, vector<1x1xf32>,
    %c0_i32_8 = arith.constant 0 : i32
    %20 = arith.cmpi eq, %arg0, %c0_i32_8 : i32
    %21 = arith.extui %20 : i1 to i32
    %c0_i32_9 = arith.constant 0 : i32
    %22 = arith.cmpi ne, %21, %c0_i32_9 : i32
    scf.if %22 {
      %c0_10 = arith.constant 0 : index
      %c0_11 = arith.constant 0 : index
      %23 = vector.load %arg2[%c0_10, %c0_11] : memref<1x1xf32, #tpu.memory_space<vmem>>, vector<1x1xf32>
      %cst_12 = arith.constant 2.500000e-02 : f32
      %24 = vector.broadcast %cst_12 : f32 to vector<1x1xf32>
      %25 = arith.mulf %23, %24 : vector<1x1xf32>
      %c0_13 = arith.constant 0 : index
      %c0_14 = arith.constant 0 : index
      %26 = vector.load %arg2[%c0_13, %c0_14] : memref<1x1xf32, #tpu.memory_space<vmem>>, vector<1x1xf32>
      tpu.vector_store %arg2[%c0_13, %c0_14], %25 {strides = array<i32>} : memref<1x1xf32, #tpu.memory_space<vmem>>, vector<1x1xf32>,
    } else {
    }
    return
  }
  func.func @transform_0(%arg0: i32) -> (i32, i32) {
    %c0_i32 = arith.constant 0 : i32
    %c0_i32_0 = arith.constant 0 : i32
    return %arg0, %c0_i32 : i32, i32
  }
  func.func @transform_1(%arg0: i32) -> (i32, i32) {
    %c0_i32 = arith.constant 0 : i32
    %c0_i32_0 = arith.constant 0 : i32
    %c0_i32_1 = arith.constant 0 : i32
    return %c0_i32, %c0_i32_0 : i32, i32
  }
}

</mosaic_0001>

<bundles_post_ra>
// kernel: tpu_custom_call.1
= control target key start
LH: loop header
LB: loop body
LE: loop exit
PB: predicated region body
PF: predicated region fallthrough
CT: control target
= control target key end

     0   :  { %6 = vsyncpa [#allocation3], 0  ;;  %s166_s0 = inlined_call_operand.hbm [shape: f32[2,20], index: 0, kind: input, shape index: {}]   ;;  %s167_s1 = inlined_call_operand.hbm [shape: f32[1,1], index: 1, kind: output, shape index: {}]  }
   0x1   :  { %7 = vsyncpa [#allocation4], 0  ;;  %s126_s6 = smov [#allocation2]   ;;  %s78_s10 = scalar_lea.hbm %s166_s0, 32 }
   0x2   :  { %s14_s7 = sshll.u32 %s126_s6, 4  ;;  %p79_p0 = scmp.ne.s32.totalorder %s166_s0, %s78_s10  ;;  %s15_s7 = int_to_ptr.vmem [resolvable:$true] %s14_s7 }
   0x3   :  { %p82_p1 = scmp.lt.u32.totalorder %s78_s10, %s166_s0 }
   0x5   :  { %p84_p2 = pnand %p82_p1, %p79_p0 }
   0x7   :  { %87 = shalt.err (!%p84_p2)
}
   0x8   :  { %s88_s15 = scalar_lea.vmem %s15_s7, 32  ;;  %p93_p4 = scmp.lt.s32.totalorder %s15_s7, %s15_s7 }
   0x9   :  { %p89_p3 = scmp.ne.s32.totalorder %s15_s7, %s88_s15  ;;  %p94_p5 = scmp.lt.s32.totalorder %s88_s15, %s88_s15 }
   0xb   :  { %p95_p6 = por %p94_p5, %p93_p4 }
   0xd   :  { %p96_p7 = pnand %p95_p6, %p89_p3 }
   0xf   :  { %99 = shalt.err (!%p96_p7)
}
  0x10   :  { %17 = dma.hbm_to_vmem [thread:$0]  %s166_s0, 32, %s15_s7, [#allocation3]  }
  0x11   :  { %122 = dma.done.wait [#allocation3], 32  }
  0x12   :  { %123 = vsyncadd [#allocation3], 4294967264  ;;  %vm36_vm0 = vcmask 156672   ;;  %v72_v0 = vld [vmem:[#allocation2] sm:$0x3]  ;;  %vm25_vm1 = vcmask 0  }
  0x13   :  { %v37_v1 = vsel %vm36_vm0, %v72_v0, 0.0  ;;  %v127_v2 = vmov 0.0   ;;  %s128_s18 = smov [#allocation5]  }
  0x14   :  { %38 = vadd.xlane.f32.xlu0 %v37_v1  ;;  %26 = vst.msk [vmem:[#allocation5] sm:$0x1] %vm25_vm1, %v127_v2  ;;  %s63_s19 = sshll.u32 %s128_s18, 4  ;;  %s64_s19 = int_to_ptr.vmem [resolvable:$true] %s63_s19 }
  0x15   :  { %s100_s20 = scalar_lea.vmem %s64_s19, 16  ;;  %s104_s21 = scalar_lea.vmem %s64_s19, 32 }
  0x16   :  { %p101_p8 = scmp.ne.s32.totalorder %s64_s19, %s100_s20  ;;  %p105_p9 = scmp.lt.s32.totalorder %s64_s19, %s64_s19 }
  0x17   :  { %p106_p10 = scmp.lt.s32.totalorder %s104_s21, %s100_s20 }
  0x19   :  { %p107_p11 = por %p106_p10, %p105_p9 }
  0x1b   :  { %v35_v10 = vld [vmem:[#allocation5] sm:$0x1]  ;;  %p108_p12 = pnand %p107_p11, %p101_p8 }
  0xa1   :  { %v39_v3 = vpop.xlane.xlu0 %38 }
  0xa2   :  { %v40_v4 = vrot.slane %v39_v3, 4 }
  0xa4   :  { %v41_v5 = vadd.f32 %v40_v4, %v39_v3 }
  0xa6   :  { %v42_v6 = vrot.slane %v41_v5, 2 }
  0xa8   :  { %v43_v7 = vadd.f32 %v42_v6, %v41_v5 }
  0xaa   :  { %v44_v8 = vrot.slane %v43_v7, 1 }
  0xac   :  { %v45_v9 = vadd.f32 %v44_v8, %v43_v7 }
  0xae   :  { %73 = vpush %v45_v9 }
  0xdf   :  { %s74_s0 = spop %73 }
  0xe0   :  { %v47_v11 = vstv %s74_s0 }
  0xe1   :  { %v48_v12 = vadd.f32 %v47_v11, %v35_v10 }
  0xe3   :  { %50 = vst.msk [vmem:[#allocation5] sm:$0x1] %vm25_vm1, %v48_v12 }
  0xea   :  { %v54_v13 = vld [vmem:[#allocation5] sm:$0x1] }
  0xeb   :  { %v55_v14 = vmul.f32 0.025, %v54_v13 }
  0xed   :  { %56 = vst.msk [vmem:[#allocation5] sm:$0x1] %vm25_vm1, %v55_v14 }
  0xee   :  { %111 = shalt.err (!%p108_p12)
}
  0xef   :  { %s112_s24 = scalar_lea.hbm %s167_s1, 16 }
  0xf0   :  { %p113_p13 = scmp.ne.s32.totalorder %s167_s1, %s112_s24  ;;  %p116_p0 = scmp.lt.u32.totalorder %s112_s24, %s167_s1 }
  0xf2   :  { %p118_p1 = pnand %p116_p0, %p113_p13 }
  0xf4   :  { %121 = shalt.err (!%p118_p1)
}
  0xf5   :  { %66 = dma.vmem_to_hbm [thread:$0]  %s64_s19, 16, %s167_s1, [#allocation4]  }
  0xf6   :  { %124 = dma.done.wait [#allocation4], 16  }
  0xf7   :  { %125 = vsyncadd [#allocation4], 4294967280 }
  0xf8   :  { %70 = vsyncpa [#allocation3], 1 }
  0xf9   :  { %71 = vsyncpa [#allocation4], 1 }

</bundles_post_ra>
